<compile_context>
chip_gen: v7x
topology: tpu7x:2x2x1
jax: 0.10.0
libtpu: 0.0.40
codegen_flags: <defaults>
</compile_context>

<pallas_src>
import functools
import math

import jax
import jax.numpy as jnp
from jax import lax
from jax.experimental import pallas as pl


def _mha_kernel(x_ref, w_qkv_ref, b_qkv_ref, wo_ref, bo_ref, o_ref, *,
                num_heads):
    B, T, d_in = x_ref.shape
    H = num_heads
    d_out = wo_ref.shape[1]
    hd = d_out // H
    mm_dtype = x_ref.dtype          # bf16 when the wrapper casts MXU operands

    # ---- Fused QKV projection: one lane-dense (B*T, d_in) @ (d_in, 3*d_out)
    x2 = x_ref[...].reshape(B * T, d_in)               # merge leading dim only
    qkv = (jnp.dot(x2, w_qkv_ref[...], preferred_element_type=jnp.float32)
           + b_qkv_ref[...])                           # (B*T, 3*d_out) f32

    # ---- Split heads with static lane slices; heads -> leading batch axis
    def split_heads(base):
        cols = [qkv[:, base + h * hd: base + (h + 1) * hd]      # (B*T, hd)
                .reshape(B, T, hd) for h in range(H)]
        # (H, B, T, hd) -> (H*B, T, hd): leading-axis stack / merge only.
        return jnp.stack(cols, axis=0).reshape(H * B, T, hd).astype(mm_dtype)

    q = split_heads(0)              # softmax scale already folded into Wq/bq
    k = split_heads(d_out)
    v = split_heads(2 * d_out)

    # ---- Attention scores: head-batched, contract the trailing hd dims
    scores = lax.dot_general(
        q, k, dimension_numbers=(((2,), (2,)), ((0,), (0,))),
        preferred_element_type=jnp.float32)            # (H*B, T, T) f32

    # Causal mask from ONE (T, T) comparison, broadcast over heads/batch.
    row = lax.broadcasted_iota(jnp.int32, (T, T), 0)
    col = lax.broadcasted_iota(jnp.int32, (T, T), 1)
    scores = jnp.where((col > row)[None, :, :], jnp.float32(-1e30), scores)

    # ---- Numerically stable softmax, all f32 (EUP approx reciprocal)
    m = jnp.max(scores, axis=-1, keepdims=True)
    p = jnp.exp(scores - m)
    denom = jnp.sum(p, axis=-1, keepdims=True)
    weights = p * pl.reciprocal(denom, approx=True)

    # ---- PV matmul (head-batched)
    ctx = lax.dot_general(
        weights.astype(mm_dtype), v,
        dimension_numbers=(((2,), (1,)), ((0,), (0,))),
        preferred_element_type=jnp.float32)            # (H*B, T, hd)

    # ---- Repack heads once onto the lane axis, one lane-dense output matmul
    ctx4 = ctx.reshape(H, B, T, hd)
    ctx_cat = jnp.concatenate([ctx4[h] for h in range(H)], axis=-1)  # (B,T,d_out)
    ctx2 = ctx_cat.reshape(B * T, d_out).astype(mm_dtype)
    out = (jnp.dot(ctx2, wo_ref[...], preferred_element_type=jnp.float32)
           + bo_ref[...])                              # (B*T, d_out) f32
    # NOTE: d_out=32 (<128 lanes) => masked vst partial stores; negligible at
    # this size, keep the output slab lane-dense when d_out scales.
    o_ref[...] = out.reshape(B, T, d_out).astype(o_ref.dtype)


def multihead_attention(x, params, *, num_heads, mxu_dtype=None):
    """x: (B, T, d_in) f32.  params: torch-Linear weights stored transposed,
    i.e. (d_in, d_out) weights and (1, d_out) biases.

    mxu_dtype=jnp.bfloat16 casts matmul operands for the v6e/v7x MXU fast
    path; accumulation and softmax stay f32.
    """
    B, T, d_in = x.shape
    d_out = params["wq"].shape[1]
    hd = d_out // num_heads
    scale = 1.0 / math.sqrt(hd)
    out_dtype = x.dtype

    # Host-side fused layout: wide dims last (lane axis), scale folded into Wq.
    w_qkv = jnp.concatenate(
        [params["wq"] * scale, params["wk"], params["wv"]], axis=1)  # (d_in, 3*d_out)
    b_qkv = jnp.concatenate(
        [params["bq"] * scale, params["bk"], params["bv"]], axis=1)  # (1, 3*d_out)
    wo, bo = params["wo"], params["bo"]

    if mxu_dtype is not None and mxu_dtype != x.dtype:
        x = x.astype(mxu_dtype)
        w_qkv = w_qkv.astype(mxu_dtype)
        wo = wo.astype(mxu_dtype)
        # Biases stay f32: they are added to f32 accumulations in-kernel.

    kernel = functools.partial(_mha_kernel, num_heads=num_heads)
    # No grid: whole (tiny) operands are single VMEM blocks; one invocation
    # handles the full batch (no per-grid-step overhead on single-TC chips).
    return pl.pallas_call(
        kernel,
        out_shape=jax.ShapeDtypeStruct((B, T, d_out), out_dtype),
    )(x, w_qkv, b_qkv, wo, bo)


def _reference(x, params, num_heads):
    """Pure-JAX reference mirroring the PyTorch forward."""
    B, T, d_in = x.shape
    d_out = params["wq"].shape[1]
    hd = d_out // num_heads

    def proj(w, b):
        return x @ w + b[0]

    q = proj(params["wq"], params["bq"]).reshape(B, T, num_heads, hd).transpose(0, 2, 1, 3)
    k = proj(params["wk"], params["bk"]).reshape(B, T, num_heads, hd).transpose(0, 2, 1, 3)
    v = proj(params["wv"], params["bv"]).reshape(B, T, num_heads, hd).transpose(0, 2, 1, 3)

    scores = jnp.einsum("bhqd,bhkd->bhqk", q, k)
    mask = jnp.triu(jnp.ones((T, T), bool), k=1)
    scores = jnp.where(mask, -jnp.inf, scores) / math.sqrt(hd)
    w = jax.nn.softmax(scores, axis=-1)
    ctx = jnp.einsum("bhqk,bhkd->bhqd", w, v).transpose(0, 2, 1, 3).reshape(B, T, d_out)
    return ctx @ params["wo"] + params["bo"][0]


if __name__ == "__main__":
    # Module config: d_in=32, d_out=32, context_len=8, num_heads=4,
    # dropout=0.0, qkv_bias=True.
    B, T, D_IN, D_OUT, HEADS = 2, 8, 32, 32, 4

    key = jax.random.PRNGKey(0)
    kx, kq, kk, kv, ko, kbq, kbk, kbv, kbo = jax.random.split(key, 9)

    x = jax.random.normal(kx, (B, T, D_IN), dtype=jnp.float32)

    scale_in = 1.0 / math.sqrt(D_IN)
    scale_out = 1.0 / math.sqrt(D_OUT)
    params = {
        "wq": jax.random.uniform(kq, (D_IN, D_OUT), jnp.float32, -scale_in, scale_in),
        "wk": jax.random.uniform(kk, (D_IN, D_OUT), jnp.float32, -scale_in, scale_in),
        "wv": jax.random.uniform(kv, (D_IN, D_OUT), jnp.float32, -scale_in, scale_in),
        "wo": jax.random.uniform(ko, (D_OUT, D_OUT), jnp.float32, -scale_out, scale_out),
        "bq": jax.random.uniform(kbq, (1, D_OUT), jnp.float32, -scale_in, scale_in),
        "bk": jax.random.uniform(kbk, (1, D_OUT), jnp.float32, -scale_in, scale_in),
        "bv": jax.random.uniform(kbv, (1, D_OUT), jnp.float32, -scale_in, scale_in),
        "bo": jax.random.uniform(kbo, (1, D_OUT), jnp.float32, -scale_out, scale_out),
    }

    ref = _reference(x, params, HEADS)

    # f32 path (matches module numerics; 1e-3 tolerance covers the EUP
    # approximate-reciprocal softmax normalization, ~2^-12 relative).
    out = jax.block_until_ready(multihead_attention(x, params, num_heads=HEADS))
    assert out.shape == (B, T, D_OUT)
    assert jnp.allclose(out, ref, atol=1e-3, rtol=1e-3), (
        f"max abs diff {jnp.max(jnp.abs(out - ref))}")

    # bf16-MXU-operand path (v6e/v7x fast path), f32 accumulation/softmax.
    out_bf16 = jax.block_until_ready(
        multihead_attention(x, params, num_heads=HEADS, mxu_dtype=jnp.bfloat16))
    assert jnp.allclose(out_bf16, ref, atol=5e-2, rtol=5e-2), (
        f"bf16 path max abs diff {jnp.max(jnp.abs(out_bf16 - ref))}")

    print("KERNEL_OK")
</pallas_src>

<mosaic_0001>
module attributes {stable_mosaic.version = 11 : i64} {
  func.func @_mha_kernel(%arg0: memref<2x8x32xf32, #tpu.memory_space<vmem>>, %arg1: memref<32x96xf32, #tpu.memory_space<vmem>>, %arg2: memref<1x96xf32, #tpu.memory_space<vmem>>, %arg3: memref<32x32xf32, #tpu.memory_space<vmem>>, %arg4: memref<1x32xf32, #tpu.memory_space<vmem>>, %arg5: memref<2x8x32xf32, #tpu.memory_space<vmem>>) attributes {dimension_semantics = [], scalar_prefetch = 0 : i64, scratch_operands = 0 : i64, tpu.core_type = #tpu.core_type<tc>} {
    %c0 = arith.constant 0 : index
    %c0_0 = arith.constant 0 : index
    %c0_1 = arith.constant 0 : index
    %0 = vector.load %arg0[%c0, %c0_0, %c0_1] : memref<2x8x32xf32, #tpu.memory_space<vmem>>, vector<2x8x32xf32>
    %1 = vector.shape_cast %0 : vector<2x8x32xf32> to vector<16x32xf32>
    %c0_2 = arith.constant 0 : index
    %c0_3 = arith.constant 0 : index
    %2 = vector.load %arg1[%c0_2, %c0_3] : memref<32x96xf32, #tpu.memory_space<vmem>>, vector<32x96xf32>
    %cst = arith.constant dense<0.000000e+00> : vector<16x96xf32>
    %3 = tpu.matmul %1, %2, %cst {dimension_numbers = #tpu.dot_dimension_numbers<[1], [0], [0], [1], [0, 0, 1, 1], [], []>} : vector<16x32xf32>, vector<32x96xf32>, vector<16x96xf32> -> vector<16x96xf32>
    %c0_4 = arith.constant 0 : index
    %c0_5 = arith.constant 0 : index
    %4 = vector.load %arg2[%c0_4, %c0_5] : memref<1x96xf32, #tpu.memory_space<vmem>>, vector<1x96xf32>
    %5 = vector.broadcast %4 : vector<1x96xf32> to vector<16x96xf32>
    %6 = arith.addf %3, %5 : vector<16x96xf32>
    %7 = vector.extract_strided_slice %6 {offsets = [0, 0], sizes = [16, 8], strides = [1, 1]} : vector<16x96xf32> to vector<16x8xf32>
    %8 = vector.shape_cast %7 : vector<16x8xf32> to vector<2x8x8xf32>
    %9 = vector.extract_strided_slice %6 {offsets = [0, 8], sizes = [16, 8], strides = [1, 1]} : vector<16x96xf32> to vector<16x8xf32>
    %10 = vector.shape_cast %9 : vector<16x8xf32> to vector<2x8x8xf32>
    %11 = vector.extract_strided_slice %6 {offsets = [0, 16], sizes = [16, 8], strides = [1, 1]} : vector<16x96xf32> to vector<16x8xf32>
    %12 = vector.shape_cast %11 : vector<16x8xf32> to vector<2x8x8xf32>
    %13 = vector.extract_strided_slice %6 {offsets = [0, 24], sizes = [16, 8], strides = [1, 1]} : vector<16x96xf32> to vector<16x8xf32>
    %14 = vector.shape_cast %13 : vector<16x8xf32> to vector<2x8x8xf32>
    %15 = vector.shape_cast %8 : vector<2x8x8xf32> to vector<1x2x8x8xf32>
    %16 = vector.shape_cast %10 : vector<2x8x8xf32> to vector<1x2x8x8xf32>
    %17 = vector.shape_cast %12 : vector<2x8x8xf32> to vector<1x2x8x8xf32>
    %18 = vector.shape_cast %14 : vector<2x8x8xf32> to vector<1x2x8x8xf32>
    %19 = tpu.concatenate %15, %16, %17, %18 in 0 : vector<1x2x8x8xf32>, vector<1x2x8x8xf32>, vector<1x2x8x8xf32>, vector<1x2x8x8xf32> -> vector<4x2x8x8xf32>
    %20 = vector.shape_cast %19 : vector<4x2x8x8xf32> to vector<8x8x8xf32>
    %21 = vector.extract_strided_slice %6 {offsets = [0, 32], sizes = [16, 8], strides = [1, 1]} : vector<16x96xf32> to vector<16x8xf32>
    %22 = vector.shape_cast %21 : vector<16x8xf32> to vector<2x8x8xf32>
    %23 = vector.extract_strided_slice %6 {offsets = [0, 40], sizes = [16, 8], strides = [1, 1]} : vector<16x96xf32> to vector<16x8xf32>
    %24 = vector.shape_cast %23 : vector<16x8xf32> to vector<2x8x8xf32>
    %25 = vector.extract_strided_slice %6 {offsets = [0, 48], sizes = [16, 8], strides = [1, 1]} : vector<16x96xf32> to vector<16x8xf32>
    %26 = vector.shape_cast %25 : vector<16x8xf32> to vector<2x8x8xf32>
    %27 = vector.extract_strided_slice %6 {offsets = [0, 56], sizes = [16, 8], strides = [1, 1]} : vector<16x96xf32> to vector<16x8xf32>
    %28 = vector.shape_cast %27 : vector<16x8xf32> to vector<2x8x8xf32>
    %29 = vector.shape_cast %22 : vector<2x8x8xf32> to vector<1x2x8x8xf32>
    %30 = vector.shape_cast %24 : vector<2x8x8xf32> to vector<1x2x8x8xf32>
    %31 = vector.shape_cast %26 : vector<2x8x8xf32> to vector<1x2x8x8xf32>
    %32 = vector.shape_cast %28 : vector<2x8x8xf32> to vector<1x2x8x8xf32>
    %33 = tpu.concatenate %29, %30, %31, %32 in 0 : vector<1x2x8x8xf32>, vector<1x2x8x8xf32>, vector<1x2x8x8xf32>, vector<1x2x8x8xf32> -> vector<4x2x8x8xf32>
    %34 = vector.shape_cast %33 : vector<4x2x8x8xf32> to vector<8x8x8xf32>
    %35 = vector.extract_strided_slice %6 {offsets = [0, 64], sizes = [16, 8], strides = [1, 1]} : vector<16x96xf32> to vector<16x8xf32>
    %36 = vector.shape_cast %35 : vector<16x8xf32> to vector<2x8x8xf32>
    %37 = vector.extract_strided_slice %6 {offsets = [0, 72], sizes = [16, 8], strides = [1, 1]} : vector<16x96xf32> to vector<16x8xf32>
    %38 = vector.shape_cast %37 : vector<16x8xf32> to vector<2x8x8xf32>
    %39 = vector.extract_strided_slice %6 {offsets = [0, 80], sizes = [16, 8], strides = [1, 1]} : vector<16x96xf32> to vector<16x8xf32>
    %40 = vector.shape_cast %39 : vector<16x8xf32> to vector<2x8x8xf32>
    %41 = vector.extract_strided_slice %6 {offsets = [0, 88], sizes = [16, 8], strides = [1, 1]} : vector<16x96xf32> to vector<16x8xf32>
    %42 = vector.shape_cast %41 : vector<16x8xf32> to vector<2x8x8xf32>
    %43 = vector.shape_cast %36 : vector<2x8x8xf32> to vector<1x2x8x8xf32>
    %44 = vector.shape_cast %38 : vector<2x8x8xf32> to vector<1x2x8x8xf32>
    %45 = vector.shape_cast %40 : vector<2x8x8xf32> to vector<1x2x8x8xf32>
    %46 = vector.shape_cast %42 : vector<2x8x8xf32> to vector<1x2x8x8xf32>
    %47 = tpu.concatenate %43, %44, %45, %46 in 0 : vector<1x2x8x8xf32>, vector<1x2x8x8xf32>, vector<1x2x8x8xf32>, vector<1x2x8x8xf32> -> vector<4x2x8x8xf32>
    %48 = vector.shape_cast %47 : vector<4x2x8x8xf32> to vector<8x8x8xf32>
    %cst_6 = arith.constant dense<0.000000e+00> : vector<8x8x8xf32>
    %49 = tpu.matmul %20, %34, %cst_6 {dimension_numbers = #tpu.dot_dimension_numbers<[2], [2], [1], [1], [0, 0, 0, 1, 1, 1], [0], [0]>} : vector<8x8x8xf32>, vector<8x8x8xf32>, vector<8x8x8xf32> -> vector<8x8x8xf32>
    %50 = tpu.iota {dimensions = array<i32: 0>} : vector<8x8xi32>
    %51 = tpu.iota {dimensions = array<i32: 1>} : vector<8x8xi32>
    %52 = arith.cmpi sgt, %51, %50 : vector<8x8xi32>
    %53 = vector.shape_cast %52 : vector<8x8xi1> to vector<1x8x8xi1>
    %cst_7 = arith.constant -1.000000e+30 : f32
    %54 = vector.shape_cast %53 : vector<1x8x8xi1> to vector<1x8x8xi1>
    %55 = vector.broadcast %54 : vector<1x8x8xi1> to vector<8x8x8xi1>
    %56 = vector.broadcast %cst_7 : f32 to vector<8x8x8xf32>
    %57 = arith.select %55, %56, %49 : vector<8x8x8xi1>, vector<8x8x8xf32>
    %cst_8 = arith.constant dense<0xFF800000> : vector<8x8xf32>
    %58 = vector.multi_reduction <maximumf>, %57, %cst_8 [2] : vector<8x8x8xf32> to vector<8x8xf32>
    %59 = vector.shape_cast %58 : vector<8x8xf32> to vector<8x8x1xf32>
    %60 = vector.broadcast %59 : vector<8x8x1xf32> to vector<8x8x8xf32>
    %61 = arith.subf %57, %60 : vector<8x8x8xf32>
    %62 = math.exp %61 : vector<8x8x8xf32>
    %cst_9 = arith.constant dense<0.000000e+00> : vector<8x8xf32>
    %63 = vector.multi_reduction <add>, %62, %cst_9 [2] : vector<8x8x8xf32> to vector<8x8xf32>
    %64 = vector.shape_cast %63 : vector<8x8xf32> to vector<8x8x1xf32>
    %65 = tpu.reciprocal %64 {approx = true} : vector<8x8x1xf32> -> vector<8x8x1xf32>
    %66 = vector.broadcast %65 : vector<8x8x1xf32> to vector<8x8x8xf32>
    %67 = arith.mulf %62, %66 : vector<8x8x8xf32>
    %cst_10 = arith.constant dense<0.000000e+00> : vector<8x8x8xf32>
    %68 = tpu.matmul %67, %48, %cst_10 {dimension_numbers = #tpu.dot_dimension_numbers<[2], [1], [1], [2], [0, 0, 0, 1, 1, 2], [0], [0]>} : vector<8x8x8xf32>, vector<8x8x8xf32>, vector<8x8x8xf32> -> vector<8x8x8xf32>
    %69 = vector.shape_cast %68 : vector<8x8x8xf32> to vector<4x2x8x8xf32>
    %70 = vector.extract_strided_slice %69 {offsets = [0, 0, 0, 0], sizes = [1, 2, 8, 8], strides = [1, 1, 1, 1]} : vector<4x2x8x8xf32> to vector<1x2x8x8xf32>
    %71 = vector.shape_cast %70 : vector<1x2x8x8xf32> to vector<2x8x8xf32>
    %72 = vector.extract_strided_slice %69 {offsets = [1, 0, 0, 0], sizes = [1, 2, 8, 8], strides = [1, 1, 1, 1]} : vector<4x2x8x8xf32> to vector<1x2x8x8xf32>
    %73 = vector.shape_cast %72 : vector<1x2x8x8xf32> to vector<2x8x8xf32>
    %74 = vector.extract_strided_slice %69 {offsets = [2, 0, 0, 0], sizes = [1, 2, 8, 8], strides = [1, 1, 1, 1]} : vector<4x2x8x8xf32> to vector<1x2x8x8xf32>
    %75 = vector.shape_cast %74 : vector<1x2x8x8xf32> to vector<2x8x8xf32>
    %76 = vector.extract_strided_slice %69 {offsets = [3, 0, 0, 0], sizes = [1, 2, 8, 8], strides = [1, 1, 1, 1]} : vector<4x2x8x8xf32> to vector<1x2x8x8xf32>
    %77 = vector.shape_cast %76 : vector<1x2x8x8xf32> to vector<2x8x8xf32>
    %78 = tpu.concatenate %71, %73, %75, %77 in 2 : vector<2x8x8xf32>, vector<2x8x8xf32>, vector<2x8x8xf32>, vector<2x8x8xf32> -> vector<2x8x32xf32>
    %79 = vector.shape_cast %78 : vector<2x8x32xf32> to vector<16x32xf32>
    %c0_11 = arith.constant 0 : index
    %c0_12 = arith.constant 0 : index
    %80 = vector.load %arg3[%c0_11, %c0_12] : memref<32x32xf32, #tpu.memory_space<vmem>>, vector<32x32xf32>
    %cst_13 = arith.constant dense<0.000000e+00> : vector<16x32xf32>
    %81 = tpu.matmul %79, %80, %cst_13 {dimension_numbers = #tpu.dot_dimension_numbers<[1], [0], [0], [1], [0, 0, 1, 1], [], []>} : vector<16x32xf32>, vector<32x32xf32>, vector<16x32xf32> -> vector<16x32xf32>
    %c0_14 = arith.constant 0 : index
    %c0_15 = arith.constant 0 : index
    %82 = vector.load %arg4[%c0_14, %c0_15] : memref<1x32xf32, #tpu.memory_space<vmem>>, vector<1x32xf32>
    %83 = vector.broadcast %82 : vector<1x32xf32> to vector<16x32xf32>
    %84 = arith.addf %81, %83 : vector<16x32xf32>
    %85 = vector.shape_cast %84 : vector<16x32xf32> to vector<2x8x32xf32>
    %c0_16 = arith.constant 0 : index
    %c0_17 = arith.constant 0 : index
    %c0_18 = arith.constant 0 : index
    %86 = vector.load %arg5[%c0_16, %c0_17, %c0_18] : memref<2x8x32xf32, #tpu.memory_space<vmem>>, vector<2x8x32xf32>
    tpu.vector_store %arg5[%c0_16, %c0_17, %c0_18], %85 {strides = array<i32>} : memref<2x8x32xf32, #tpu.memory_space<vmem>>, vector<2x8x32xf32>,
    return
  }
}

</mosaic_0001>

<bundles_post_ra>
// kernel: tpu_custom_call.1
= control target key start
LH: loop header
LB: loop body
LE: loop exit
PB: predicated region body
PF: predicated region fallthrough
CT: control target
= control target key end

     0   :  { %10 = vsyncpa [#allocation3], 0  ;;  %s2270_s0 = inlined_call_operand.hbm [shape: f32[2,8,32], index: 0, kind: input, shape index: {}]   ;;  %s2271_s1 = inlined_call_operand.hbm [shape: f32[32,96], index: 1, kind: input, shape index: {}]   ;;  %s2272_s2 = inlined_call_operand.vmem [shape: f32[1,96], index: 2, kind: input, shape index: {}]   ;;  %s2273_s3 = inlined_call_operand.hbm [shape: f32[32,32], index: 3, kind: input, shape index: {}]   ;;  %s2274_s4 = inlined_call_operand.vmem [shape: f32[1,32], index: 4, kind: input, shape index: {}]   ;;  %s2275_s5 = inlined_call_operand.hbm [shape: f32[2,8,32], index: 5, kind: output, shape index: {}]  }
   0x1   :  { %11 = vsyncpa [#allocation6], 0 }
   0x2   :  { %12 = vsyncpa [#allocation4], 0  ;;  %s1968_s18 = smov [#allocation5]   ;;  %s1969_s20 = smov [#allocation2]  }
   0x3   :  { %s30_s19 = sshll.u32 %s1968_s18, 4  ;;  %s18_s21 = sshll.u32 %s1969_s20, 4  ;;  %s31_s19 = int_to_ptr.vmem [resolvable:$true] %s30_s19  ;;  %s2013_s21 = int_to_ptr.vmem [resolvable:$true] %s18_s21 }
   0x4   :  { %s1874_s24 = scalar_lea.hbm %s2271_s1, 512 }
   0x5   :  { %p1875_p0 = scmp.ne.s32.totalorder %s2271_s1, %s1874_s24  ;;  %p1878_p1 = scmp.lt.u32.totalorder %s1874_s24, %s2271_s1 }
   0x7   :  { %p1880_p2 = pnand %p1878_p1, %p1875_p0 }
   0x9   :  { %1883 = shalt.err (!%p1880_p2)
}
   0xa   :  { %s1884_s29 = scalar_lea.vmem %s31_s19, 512  ;;  %p1889_p4 = scmp.lt.s32.totalorder %s31_s19, %s31_s19 }
   0xb   :  { %p1885_p3 = scmp.ne.s32.totalorder %s31_s19, %s1884_s29  ;;  %p1890_p5 = scmp.lt.s32.totalorder %s1884_s29, %s1884_s29 }
   0xd   :  { %p1891_p6 = por %p1890_p5, %p1889_p4 }
   0xf   :  { %p1892_p7 = pnand %p1891_p6, %p1885_p3 }
  0x11   :  { %1895 = shalt.err (!%p1892_p7)
}
  0x12   :  { %s1970_s30 = smov 128   ;;  %s1971_s6 = smov 8  }
  0x13   :  { %36 = dma.hbm_to_vmem [thread:$0]  %s2271_s1, 512, %s31_s19, [#allocation6], %s1970_s30, %s1970_s30, %s1971_s6  }
  0x14   :  { %s1896_s11 = scalar_lea.hbm %s2270_s0, 256 }
  0x15   :  { %p1897_p8 = scmp.ne.s32.totalorder %s2270_s0, %s1896_s11  ;;  %p1900_p9 = scmp.lt.u32.totalorder %s1896_s11, %s2270_s0 }
  0x17   :  { %p1902_p10 = pnand %p1900_p9, %p1897_p8 }
  0x19   :  { %1905 = shalt.err (!%p1902_p10)
}
  0x1a   :  { %s1906_s16 = scalar_lea.vmem %s2013_s21, 256  ;;  %p1911_p12 = scmp.lt.s32.totalorder %s2013_s21, %s2013_s21 }
  0x1b   :  { %p1907_p11 = scmp.ne.s32.totalorder %s2013_s21, %s1906_s16  ;;  %p1912_p13 = scmp.lt.s32.totalorder %s1906_s16, %s1906_s16 }
  0x1d   :  { %p1913_p0 = por %p1912_p13, %p1911_p12 }
  0x1f   :  { %p1914_p1 = pnand %p1913_p0, %p1907_p11 }
  0x21   :  { %1917 = shalt.err (!%p1914_p1)
}
  0x22   :  { %24 = dma.hbm_to_vmem [thread:$0]  %s2270_s0, 256, %s2013_s21, [#allocation3], %s1970_s30, %s1970_s30, %s1971_s6  }
  0x23   :  { %s1972_s18 = smov [#allocation7]   ;;  %s1918_s23 = scalar_lea.hbm %s2273_s3, 512 }
  0x24   :  { %s44_s19 = sshll.u32 %s1972_s18, 4  ;;  %p1919_p2 = scmp.ne.s32.totalorder %s2273_s3, %s1918_s23  ;;  %s45_s19 = int_to_ptr.vmem [resolvable:$true] %s44_s19 }
  0x25   :  { %p1922_p3 = scmp.lt.u32.totalorder %s1918_s23, %s2273_s3 }
  0x27   :  { %p1924_p4 = pnand %p1922_p3, %p1919_p2 }
  0x29   :  { %1927 = shalt.err (!%p1924_p4)
}
  0x2a   :  { %s1928_s28 = scalar_lea.vmem %s45_s19, 512  ;;  %p1933_p6 = scmp.lt.s32.totalorder %s45_s19, %s45_s19 }
  0x2b   :  { %p1929_p5 = scmp.ne.s32.totalorder %s45_s19, %s1928_s28  ;;  %p1934_p7 = scmp.lt.s32.totalorder %s1928_s28, %s1928_s28 }
  0x2d   :  { %p1935_p8 = por %p1934_p7, %p1933_p6 }
  0x2f   :  { %p1936_p9 = pnand %p1935_p8, %p1929_p5 }
  0x31   :  { %1939 = shalt.err (!%p1936_p9)
}
  0x32   :  { %50 = dma.hbm_to_vmem [thread:$0]  %s2273_s3, 512, %s45_s19, [#allocation6], %s1970_s30, %s1970_s30, %s1971_s6  }
  0x33   :  { %1962 = dma.done.wait [#allocation3], 256  }
  0x34   :  { %1963 = vsyncadd [#allocation3], 4294967040 }
  0x35   :  { %1964 = dma.done.wait [#allocation6], 1024  }
  0x36   :  { %1965 = vsyncadd [#allocation6], 4294966272  ;;  %vm75_vm0 = vcmask 261120   ;;  %v64_v0 = vld [vmem:[#allocation5] sm:$0xff]  ;;  %v65_v1 = vld [vmem:[#allocation5 + $0x8] sm:$0xff]  ;;  %v1973_v10 = vmov 0.0   ;;  %v780_v28 = vlaneseq }
  0x37   :  { %v66_v2 = vld [vmem:[#allocation5 + $0x10] sm:$0xff]  ;;  %v1811_v3 = vpack.c.bf16 %v65_v1, %v64_v0  ;;  %v67_v4 = vld [vmem:[#allocation5 + $0x18] sm:$0xff]  ;;  %1720 = vmatprep.subr.mxu1 %v1973_v10  ;;  %s1974_s7 = smov 112   ;;  %s1975_s8 = smov 120   ;;  %vm1976_vm1 = vmmov 0   ;;  %vm173_vm2 = vcmask 64512  }
  0x38   :  { %v62_v5 = vld [vmem:[#allocation2] sm:$0xff]  ;;  %v1815_v6 = vpack.c.bf16 %v67_v4, %v66_v2  ;;  %v63_v7 = vld [vmem:[#allocation2 + $0x8] sm:$0xff]  ;;  %1722 = vmatprep.mubr.msk.f32.mxu1 %vm1976_vm1, %v1973_v10  ;;  %s1978_s9 = smov 96   ;;  %v781_v29 = vshrl.u32 %v780_v28, 7  ;;  %v783_v30 = vand.u32 127, %v780_v28  ;;  %s1979_s10 = smov 64  }
  0x39   :  { %1717 = vmatprep.mubr.msk.f32.mxu0 %vm75_vm0, %v62_v5  ;;  %1812 = vmatprep.subr.bf16.mxu0 %v1811_v3  ;;  %v1635_v8 = vld [vmem:[%s2272_s2] ss:$0 sm:$0xff]  ;;  %s1977_s2 = smov 104   ;;  %s1980_s11 = smov 16   ;;  %vm1517_vm4 = vcmask 130048   ;;  %vm1520_vm5 = vcmask 195584  }
  0x3a   :  { %1814 = vmatpush3.bf16.msra.mxu0 %v1811_v3  ;;  %vm2154_vm3 = vcmp.gt.s32.totalorder %v783_v30, %v781_v29  ;;  %s1981_s12 = smov 24   ;;  %s1982_s15 = smov [#allocation8]  }
  0x3b   :  { %1816 = vmatprep.subr.bf16.mxu0 %v1815_v6  ;;  %s1622_s16 = sshll.u32 %s1982_s15, 4  ;;  %s1623_s16 = int_to_ptr.vmem [resolvable:$true] %s1622_s16 }
  0x3c   :  { %s1940_s1 = scalar_lea.vmem %s1623_s16, 256  ;;  %p1945_p11 = scmp.lt.s32.totalorder %s1623_s16, %s1623_s16 }
  0x3d   :  { %p1941_p10 = scmp.ne.s32.totalorder %s1623_s16, %s1940_s1  ;;  %p1946_p12 = scmp.lt.s32.totalorder %s1940_s1, %s1940_s1 }
  0x3e   :  { %1818 = vmatpush3.bf16.msra.mxu0 %v1815_v6 }
  0x3f   :  { %1740 = vmatprep.subr.mxu0 %v1973_v10  ;;  %p1947_p13 = por %p1946_p12, %p1945_p11 }
  0x41   :  { %1718 = vmatmul.mubr.msk.f32.vlgmr.msra.gmra.mrb[0].mxu0 %vm75_vm0, %v63_v7  ;;  %p1948_p0 = pnand %p1947_p13, %p1941_p10 }
  0x42   :  { %1742 = vmatprep.mubr.msk.f32.mxu0 %vm1976_vm1, %v1973_v10 }
 0x114   :  { %v1719_v9 = vpop.f32.mrb[0].mxu0 }
 0x115   :  { %v148_v11 = vpop.f32.mrb[1].mxu0  ;;  %v2080_v13 = vadd.f32 %v1719_v9, %v1635_v8 }
 0x116   :  { %v2072_v12 = vadd.f32 %v1635_v8, %v148_v11 }
 0x118   :  { %163 = vrot.lane.b32.xlu1 %v2072_v12, %s1974_s7  ;;  %159 = vrot.lane.b32.xlu0 %v2072_v12, %s1975_s8 }
 0x11c   :  { %165 = vrot.lane.b32.xlu1 %v2080_v13, %s1974_s7  ;;  %161 = vrot.lane.b32.xlu0 %v2080_v13, %s1975_s8 }
 0x120   :  { %169 = vrot.lane.b32.xlu1 %v2080_v13, %s1977_s2  ;;  %167 = vrot.lane.b32.xlu0 %v2072_v12, %s1977_s2 }
 0x124   :  { %248 = vrot.lane.b32.xlu1 %v2080_v13, %s1978_s9  ;;  %171 = vrot.lane.b32.xlu0 %v2072_v12, %s1978_s9 }
 0x18a   :  { %v2088_v14 = vpop.permute.xlu1 %163  ;;  %v2090_v15 = vpop.permute.xlu0 %159 }
 0x18b   :  { %324 = vrot.lane.b32.xlu0 %v2090_v15, %s1978_s9 }
 0x18e   :  { %v2093_v16 = vpop.permute.xlu1 %165  ;;  %v2095_v17 = vpop.permute.xlu0 %161 }
 0x18f   :  { %476 = vrot.lane.b32.xlu0 %v2088_v14, %s1978_s9  ;;  %400 = vrot.lane.b32.xlu1 %v2095_v17, %s1978_s9 }
 0x192   :  { %v2099_v18 = vpop.permute.xlu0 %167  ;;  %v2103_v19 = vpop.permute.xlu1 %169 }
 0x193   :  { %552 = vrot.lane.b32.xlu1 %v2093_v16, %s1978_s9  ;;  %628 = vrot.lane.b32.xlu0 %v2099_v18, %s1978_s9 }
 0x196   :  { %v172_v20 = vpop.permute.xlu0 %171  ;;  %v249_v21 = vpop.permute.xlu1 %248 }
 0x197   :  { %704 = vrot.lane.b32.xlu1 %v2103_v19, %s1978_s9  ;;  %1721 = vmatpush3.xpose.msk.msra.mxu1 %vm173_vm2, %v172_v20 }
 0x198   :  { %1725 = vmatprep.subr.mxu1 %v1973_v10 }
 0x19a   :  { %1723 = vmatmul.mubr.msk.f32.vlgmr.msra.gmra.mrb[0].mxu1 %vm173_vm2, %v2072_v12 }
 0x19b   :  { %1726 = vmatpush3.xpose.msk.msra.mxu1 %vm173_vm2, %v249_v21  ;;  %1727 = vmatprep.mubr.msk.f32.mxu1 %vm1976_vm1, %v1973_v10 }
 0x19c   :  { %1730 = vmatprep.subr.mxu1 %v1973_v10 }
 0x19e   :  { %1728 = vmatmul.mubr.msk.f32.vlgmr.msra.gmra.mrb[2].mxu1 %vm173_vm2, %v2080_v13 }
 0x19f   :  { %1732 = vmatprep.mubr.msk.f32.mxu1 %vm1976_vm1, %v1973_v10 }
 0x1fd   :  { %v325_v22 = vpop.permute.xlu0 %324 }
 0x1fe   :  { %1731 = vmatpush3.xpose.msk.msra.mxu1 %vm173_vm2, %v325_v22 }
 0x1ff   :  { %1735 = vmatprep.subr.mxu1 %v1973_v10 }
 0x201   :  { %v401_v23 = vpop.permute.xlu1 %400  ;;  %1733 = vmatmul.mubr.msk.f32.vlgmr.msra.gmra.mrb[4].mxu1 %vm173_vm2, %v2090_v15  ;;  %v477_v24 = vpop.permute.xlu0 %476 }
 0x202   :  { %1736 = vmatpush3.xpose.msk.msra.mxu1 %vm173_vm2, %v401_v23  ;;  %1741 = vmatpush3.xpose.msk.msra.mxu0 %vm173_vm2, %v477_v24 }
 0x203   :  { %1737 = vmatprep.mubr.msk.f32.mxu1 %vm1976_vm1, %v1973_v10  ;;  %1745 = vmatprep.subr.mxu1 %v1973_v10 }
 0x204   :  { %1750 = vmatprep.subr.mxu0 %v1973_v10 }
 0x205   :  { %v553_v25 = vpop.permute.xlu1 %552  ;;  %1738 = vmatmul.mubr.msk.f32.vlgmr.msra.gmra.mrb[6].mxu1 %vm173_vm2, %v2095_v17  ;;  %1743 = vmatmul.mubr.msk.f32.vlgmr.msra.gmra.mrb[2].mxu0 %vm173_vm2, %v2088_v14  ;;  %v629_v26 = vpop.permute.xlu0 %628 }
 0x206   :  { %1746 = vmatpush3.xpose.msk.msra.mxu1 %vm173_vm2, %v553_v25  ;;  %1751 = vmatpush3.xpose.msk.msra.mxu0 %vm173_vm2, %v629_v26 }
 0x207   :  { %1747 = vmatprep.mubr.msk.f32.mxu1 %vm1976_vm1, %v1973_v10  ;;  %1752 = vmatprep.mubr.msk.f32.mxu0 %vm1976_vm1, %v1973_v10 }
 0x208   :  { %1755 = vmatprep.subr.mxu1 %v1973_v10  ;;  %1760 = vmatprep.subr.mxu0 %v1973_v10 }
 0x209   :  { %v705_v27 = vpop.permute.xlu1 %704  ;;  %1748 = vmatmul.mubr.msk.f32.vlgmr.msra.gmra.mrb[8].mxu1 %vm173_vm2, %v2093_v16  ;;  %1753 = vmatmul.mubr.msk.f32.vlgmr.msra.gmra.mrb[4].mxu0 %vm173_vm2, %v2099_v18 }
 0x20a   :  { %1756 = vmatpush3.xpose.msk.msra.mxu1 %vm173_vm2, %v705_v27  ;;  %1757 = vmatprep.mubr.msk.f32.mxu1 %vm1976_vm1, %v1973_v10 }
 0x20b   :  { %1765 = vmatprep.subr.mxu1 %v1973_v10  ;;  %1762 = vmatprep.mubr.msk.f32.mxu0 %vm1976_vm1, %v1973_v10 }
 0x20d   :  { %1758 = vmatmul.mubr.msk.f32.vlgmr.msra.gmra.mrb[10].mxu1 %vm173_vm2, %v2103_v19 }
 0x20e   :  { %1767 = vmatprep.mubr.msk.f32.mxu1 %vm1976_vm1, %v1973_v10 }
 0x26d   :  { %v244_v32 = vpop.f32.mrb[0].mxu1 }
 0x26e   :  { %v787_v33 = vsel %vm2154_vm3, -1e+30, %v244_v32  ;;  %v1724_v34 = vpop.f32.mrb[1].mxu1 }
 0x26f   :  { %v795_v35 = vsel %vm173_vm2, %v787_v33, -inf }
 0x270   :  { %796 = vmax.xlane.f32.xlu0 %v795_v35 }
 0x271   :  { %v320_v36 = vpop.f32.mrb[2].mxu1 }
 0x272   :  { %v788_v37 = vsel %vm2154_vm3, -1e+30, %v320_v36  ;;  %v1729_v38 = vpop.f32.mrb[3].mxu1 }
 0x273   :  { %v798_v39 = vsel %vm173_vm2, %v788_v37, -inf }
 0x274   :  { %799 = vmax.xlane.f32.xlu1 %v798_v39 }
 0x2d4   :  { %v396_v40 = vpop.f32.mrb[4].mxu1 }
 0x2d5   :  { %v789_v41 = vsel %vm2154_vm3, -1e+30, %v396_v40  ;;  %v1734_v42 = vpop.f32.mrb[5].mxu1 }
 0x2d6   :  { %v801_v43 = vsel %vm173_vm2, %v789_v41, -inf }
 0x2d7   :  { %802 = vmax.xlane.f32.xlu0 %v801_v43 }
 0x2d8   :  { %v472_v44 = vpop.f32.mrb[6].mxu1  ;;  %v548_v45 = vpop.f32.mrb[2].mxu0 }
 0x2d9   :  { %v790_v46 = vsel %vm2154_vm3, -1e+30, %v472_v44  ;;  %v791_v47 = vsel %vm2154_vm3, -1e+30, %v548_v45  ;;  %v1739_v48 = vpop.f32.mrb[7].mxu1  ;;  %v1744_v49 = vpop.f32.mrb[3].mxu0 }
 0x2da   :  { %v804_v50 = vsel %vm173_vm2, %v790_v46, -inf  ;;  %v807_v51 = vsel %vm173_vm2, %v791_v47, -inf }
 0x2db   :  { %805 = vmax.xlane.f32.xlu0 %v804_v50  ;;  %808 = vmax.xlane.f32.xlu1 %v807_v51 }
 0x2dc   :  { %v624_v52 = vpop.f32.mrb[8].mxu1  ;;  %v700_v53 = vpop.f32.mrb[4].mxu0 }
 0x2dd   :  { %v792_v54 = vsel %vm2154_vm3, -1e+30, %v624_v52  ;;  %v793_v55 = vsel %vm2154_vm3, -1e+30, %v700_v53  ;;  %v1749_v56 = vpop.f32.mrb[9].mxu1  ;;  %v1754_v57 = vpop.f32.mrb[5].mxu0 }
 0x2de   :  { %v810_v58 = vsel %vm173_vm2, %v792_v54, -inf  ;;  %v813_v59 = vsel %vm173_vm2, %v793_v55, -inf }
 0x2df   :  { %811 = vmax.xlane.f32.xlu0 %v810_v58  ;;  %814 = vmax.xlane.f32.xlu1 %v813_v59 }
 0x2e0   :  { %v776_v60 = vpop.f32.mrb[10].mxu1 }
 0x2e1   :  { %v794_v61 = vsel %vm2154_vm3, -1e+30, %v776_v60  ;;  %v1759_v62 = vpop.f32.mrb[11].mxu1 }
 0x2e2   :  { %v816_v63 = vsel %vm173_vm2, %v794_v61, -inf }
 0x2e3   :  { %817 = vmax.xlane.f32.xlu0 %v816_v63 }
 0x2f0   :  { %883 = vrot.lane.b32.xlu1 %v2072_v12, %s1979_s10 }
 0x2f4   :  { %1035 = vrot.lane.b32.xlu1 %v2090_v15, %s1979_s10 }
 0x2f8   :  { %1111 = vrot.lane.b32.xlu1 %v2095_v17, %s1979_s10 }
 0x2f9   :  { %959 = vrot.lane.b32.xlu0 %v2080_v13, %s1979_s10 }
 0x2fc   :  { %1263 = vrot.lane.b32.xlu1 %v2093_v16, %s1979_s10 }
 0x2fd   :  { %1187 = vrot.lane.b32.xlu0 %v2088_v14, %s1979_s10  ;;  %v797_v2 = vpop.xlane.xlu0 %796 }
 0x2fe   :  { %v819_v3 = vsub.f32 %v787_v33, %v797_v2 }
 0x300   :  { %v827_v5 = vmul.f32 1.442695, %v819_v3 }
 0x301   :  { %v800_v0 = vpop.xlane.xlu1 %799 }
 0x302   :  { %v820_v1 = vsub.f32 %v788_v37, %v800_v0 }
 0x304   :  { %v829_v4 = vmul.f32 1.442695, %v820_v1 }
 0x306   :  { %1842 = vpow2.f32 %v829_v4 }
 0x307   :  { %1844 = vpow2.f32 %v827_v5 }
 0x310   :  { %v2194_v6 = vpop.eup %1842 }
 0x311   :  { %v846_v7 = vsel %vm173_vm2, %v2194_v6, 0.0  ;;  %v2198_v8 = vpop.eup %1844 }
 0x312   :  { %v843_v9 = vsel %vm173_vm2, %v2198_v8, 0.0 }
 0x31c   :  { %847 = vadd.xlane.f32.xlu0 %v846_v7 }
 0x320   :  { %844 = vadd.xlane.f32.xlu1 %v843_v9 }
 0x364   :  { %v803_v11 = vpop.xlane.xlu0 %802 }
 0x365   :  { %v821_v12 = vsub.f32 %v789_v41, %v803_v11 }
 0x367   :  { %v831_v13 = vmul.f32 1.442695, %v821_v12 }
 0x368   :  { %v809_v14 = vpop.xlane.xlu1 %808  ;;  %v806_v15 = vpop.xlane.xlu0 %805 }
 0x369   :  { %1846 = vpow2.f32 %v831_v13  ;;  %v823_v16 = vsub.f32 %v791_v47, %v809_v14  ;;  %v822_v17 = vsub.f32 %v790_v46, %v806_v15  ;;  %v1523_v14 = vld [vmem:[#allocation7] sm:$0xff]  ;;  %v1524_v15 = vld [vmem:[#allocation7 + $0x8] sm:$0xff] }
 0x36b   :  { %v835_v20 = vmul.f32 1.442695, %v823_v16  ;;  %v833_v21 = vmul.f32 1.442695, %v822_v17  ;;  %v1819_v16 = vpack.c.bf16 %v1524_v15, %v1523_v14  ;;  %v1525_v17 = vld [vmem:[#allocation7 + $0x10] sm:$0xff] }
 0x36c   :  { %v815_v22 = vpop.xlane.xlu1 %814  ;;  %v812_v23 = vpop.xlane.xlu0 %811 }
 0x36d   :  { %1848 = vpow2.f32 %v835_v20  ;;  %v825_v24 = vsub.f32 %v793_v55, %v815_v22  ;;  %v824_v25 = vsub.f32 %v792_v54, %v812_v23  ;;  %v1526_v20 = vld [vmem:[#allocation7 + $0x18] sm:$0xff] }
 0x36e   :  { %1850 = vpow2.f32 %v833_v21  ;;  %v1823_v21 = vpack.c.bf16 %v1526_v20, %v1525_v17 }
 0x36f   :  { %v839_v26 = vmul.f32 1.442695, %v825_v24  ;;  %v837_v27 = vmul.f32 1.442695, %v824_v25 }
 0x370   :  { %v884_v28 = vpop.permute.xlu1 %883  ;;  %v818_v29 = vpop.xlane.xlu0 %817 }
 0x371   :  { %1852 = vpow2.f32 %v839_v26  ;;  %v826_v30 = vsub.f32 %v794_v61, %v818_v29  ;;  %1761 = vmatpush3.msra.mxu0 %v884_v28 }
 0x372   :  { %1854 = vpow2.f32 %v837_v27  ;;  %1770 = vmatprep.subr.mxu0 %v1973_v10 }
 0x373   :  { %v1847_v31 = vpop.eup %1846  ;;  %v841_v32 = vmul.f32 1.442695, %v826_v30 }
 0x374   :  { %v960_v33 = vpop.permute.xlu0 %959  ;;  %v849_v34 = vsel %vm173_vm2, %v1847_v31, 0.0  ;;  %v1036_v45 = vpop.permute.xlu1 %1035 }
 0x375   :  { %1856 = vpow2.f32 %v841_v32  ;;  %850 = vadd.xlane.f32.xlu1 %v849_v34  ;;  %1766 = vmatpush3.msra.mxu1 %v960_v33 }
 0x376   :  { %1775 = vmatprep.subr.mxu1 %v1973_v10 }
 0x377   :  { %v1849_v35 = vpop.eup %1848 }
 0x378   :  { %v1851_v36 = vpop.eup %1850  ;;  %v855_v37 = vsel %vm173_vm2, %v1849_v35, 0.0  ;;  %v1112_v46 = vpop.permute.xlu1 %1111 }
 0x379   :  { %856 = vadd.xlane.f32.xlu1 %v855_v37  ;;  %v852_v38 = vsel %vm173_vm2, %v1851_v36, 0.0  ;;  %v1188_v47 = vpop.permute.xlu0 %1187 }
 0x37a   :  { %853 = vadd.xlane.f32.xlu0 %v852_v38 }
 0x37b   :  { %v1853_v39 = vpop.eup %1852 }
 0x37c   :  { %v1855_v40 = vpop.eup %1854  ;;  %v861_v41 = vsel %vm173_vm2, %v1853_v39, 0.0  ;;  %v1264_v48 = vpop.permute.xlu1 %1263 }
 0x37d   :  { %862 = vadd.xlane.f32.xlu1 %v861_v41  ;;  %v858_v42 = vsel %vm173_vm2, %v1855_v40, 0.0 }
 0x37e   :  { %859 = vadd.xlane.f32.xlu0 %v858_v42 }
 0x37f   :  { %v2209_v43 = vpop.eup %1856 }
 0x380   :  { %v864_v44 = vsel %vm173_vm2, %v2209_v43, 0.0 }
 0x382   :  { %865 = vadd.xlane.f32.xlu0 %v864_v44 }
 0x38e   :  { %1415 = vrot.lane.b32.xlu1 %v2103_v19, %s1979_s10 }
 0x398   :  { %1339 = vrot.lane.b32.xlu0 %v2099_v18, %s1979_s10 }
 0x3a9   :  { %v848_v49 = vpop.xlane.xlu0 %847 }
 0x3aa   :  { %1858 = vrcp.f32 %v848_v49 }
 0x3ad   :  { %v845_v50 = vpop.xlane.xlu1 %844 }
 0x3ae   :  { %1860 = vrcp.f32 %v845_v50 }
 0x3b4   :  { %v1859_v51 = vpop.eup %1858 }
 0x3b5   :  { %v876_v52 = vmul.f32 %v1859_v51, %v2194_v6 }
 0x3b7   :  { %1768 = vmatmul.mubr.msk.f32.vlgmr.msra.gmra.mrb[12].mxu1 %vm173_vm2, %v876_v52 }
 0x3b8   :  { %v1861_v53 = vpop.eup %1860  ;;  %1776 = vmatpush3.msra.mxu1 %v1112_v46  ;;  %1777 = vmatprep.mubr.msk.f32.mxu1 %vm1976_vm1, %v1973_v10 }
 0x3b9   :  { %v875_v18 = vmul.f32 %v1861_v53, %v2198_v8  ;;  %1785 = vmatprep.subr.mxu1 %v1973_v10 }
 0x3bb   :  { %1763 = vmatmul.mubr.msk.f32.vlgmr.msra.gmra.mrb[6].mxu0 %vm173_vm2, %v875_v18 }
 0x3bc   :  { %1771 = vmatpush3.msra.mxu0 %v1036_v45  ;;  %1772 = vmatprep.mubr.msk.f32.mxu0 %vm1976_vm1, %v1973_v10  ;;  %v1662_v45 = vld [vmem:[%s2274_s4] ss:$0 sm:$0xff] }
 0x3bd   :  { %1780 = vmatprep.subr.mxu0 %v1973_v10 }
 0x402   :  { %v851_v19 = vpop.xlane.xlu1 %850 }
 0x403   :  { %1862 = vrcp.f32 %v851_v19 }
 0x406   :  { %v857_v54 = vpop.xlane.xlu1 %856 }
 0x407   :  { %1864 = vrcp.f32 %v857_v54  ;;  %v854_v55 = vpop.xlane.xlu0 %853 }
 0x408   :  { %1866 = vrcp.f32 %v854_v55 }
 0x40a   :  { %v863_v56 = vpop.xlane.xlu1 %862 }
 0x40b   :  { %1868 = vrcp.f32 %v863_v56  ;;  %v860_v57 = vpop.xlane.xlu0 %859 }
 0x40c   :  { %1870 = vrcp.f32 %v860_v57 }
 0x40d   :  { %v1863_v58 = vpop.eup %1862 }
 0x40e   :  { %v877_v59 = vmul.f32 %v1863_v58, %v1847_v31  ;;  %v1416_v6 = vpop.permute.xlu1 %1415 }
 0x40f   :  { %v866_v60 = vpop.xlane.xlu0 %865 }
 0x410   :  { %1872 = vrcp.f32 %v866_v60  ;;  %1773 = vmatmul.mubr.msk.f32.vlgmr.msra.gmra.mrb[8].mxu0 %vm173_vm2, %v877_v59 }
 0x411   :  { %v1865_v61 = vpop.eup %1864  ;;  %1781 = vmatpush3.msra.mxu0 %v1188_v47  ;;  %1782 = vmatprep.mubr.msk.f32.mxu0 %vm1976_vm1, %v1973_v10 }
 0x412   :  { %v1867_v62 = vpop.eup %1866  ;;  %v879_v63 = vmul.f32 %v1865_v61, %v1849_v35  ;;  %1790 = vmatprep.subr.mxu0 %v1973_v10 }
 0x413   :  { %v878_v0 = vmul.f32 %v1867_v62, %v1851_v36  ;;  %v1340_v1 = vpop.permute.xlu0 %1339 }
 0x414   :  { %1783 = vmatmul.mubr.msk.f32.vlgmr.msra.gmra.mrb[10].mxu0 %vm173_vm2, %v879_v63 }
 0x415   :  { %v1869_v2 = vpop.eup %1868  ;;  %1778 = vmatmul.mubr.msk.f32.vlgmr.msra.gmra.mrb[14].mxu1 %vm173_vm2, %v878_v0  ;;  %1791 = vmatpush3.msra.mxu0 %v1340_v1 }
 0x416   :  { %v1871_v3 = vpop.eup %1870  ;;  %v881_v4 = vmul.f32 %v1869_v2, %v1853_v39  ;;  %1786 = vmatpush3.msra.mxu1 %v1264_v48  ;;  %1787 = vmatprep.mubr.msk.f32.mxu1 %vm1976_vm1, %v1973_v10 }
 0x417   :  { %v880_v5 = vmul.f32 %v1871_v3, %v1855_v40  ;;  %1792 = vmatprep.mubr.msk.f32.mxu0 %vm1976_vm1, %v1973_v10  ;;  %1795 = vmatprep.subr.mxu1 %v1973_v10 }
 0x418   :  { %1793 = vmatmul.mubr.msk.f32.vlgmr.msra.gmra.mrb[12].mxu0 %vm173_vm2, %v881_v4  ;;  %1820 = vmatprep.subr.bf16.mxu0 %v1819_v16 }
 0x419   :  { %1788 = vmatmul.mubr.msk.f32.vlgmr.msra.gmra.mrb[16].mxu1 %vm173_vm2, %v880_v5  ;;  %1822 = vmatpush3.bf16.msra.mxu0 %v1819_v16 }
 0x41a   :  { %v1873_v7 = vpop.eup %1872  ;;  %1796 = vmatpush3.msra.mxu1 %v1416_v6  ;;  %1797 = vmatprep.mubr.msk.f32.mxu1 %vm1976_vm1, %v1973_v10 }
 0x41b   :  { %v882_v8 = vmul.f32 %v1873_v7, %v2209_v43  ;;  %1824 = vmatprep.subr.bf16.mxu0 %v1823_v21 }
 0x41d   :  { %1798 = vmatmul.mubr.msk.f32.vlgmr.msra.gmra.mrb[18].mxu1 %vm173_vm2, %v882_v8  ;;  %1826 = vmatpush3.bf16.msra.mxu0 %v1823_v21 }
 0x48a   :  { %v1031_v9 = vpop.f32.mrb[12].mxu1 }
 0x48b   :  { %v1769_v11 = vpop.f32.mrb[13].mxu1 }
 0x48e   :  { %v955_v12 = vpop.f32.mrb[6].mxu0 }
 0x48f   :  { %v1764_v13 = vpop.f32.mrb[7].mxu0 }
 0x4e3   :  { %v1107_v22 = vpop.f32.mrb[8].mxu0 }
 0x4e4   :  { %v1774_v10 = vpop.f32.mrb[9].mxu0  ;;  %1493 = vrot.lane.b32.xlu0 %v1107_v22, %s1971_s6 }
 0x4e7   :  { %v1259_v23 = vpop.f32.mrb[10].mxu0 }
 0x4e8   :  { %v1183_v24 = vpop.f32.mrb[14].mxu1  ;;  %1501 = vrot.lane.b32.xlu0 %v1259_v23, %s1980_s11  ;;  %v1784_v25 = vpop.f32.mrb[11].mxu0 }
 0x4e9   :  { %1495 = vrot.lane.b32.xlu1 %v1183_v24, %s1971_s6  ;;  %v1779_v26 = vpop.f32.mrb[15].mxu1 }
 0x4eb   :  { %v1411_v27 = vpop.f32.mrb[12].mxu0 }
 0x4ec   :  { %v1335_v28 = vpop.f32.mrb[16].mxu1  ;;  %1509 = vrot.lane.b32.xlu0 %v1411_v27, %s1981_s12  ;;  %v1794_v29 = vpop.f32.mrb[13].mxu0 }
 0x4ed   :  { %1503 = vrot.lane.b32.xlu1 %v1335_v28, %s1980_s11  ;;  %v1789_v30 = vpop.f32.mrb[17].mxu1 }
 0x4f0   :  { %v1487_v31 = vpop.f32.mrb[18].mxu1 }
 0x4f1   :  { %1511 = vrot.lane.b32.xlu1 %v1487_v31, %s1981_s12  ;;  %v1799_v32 = vpop.f32.mrb[19].mxu1 }
 0x556   :  { %v1494_v33 = vpop.permute.xlu0 %1493 }
 0x557   :  { %v1515_v36 = vsel %vm173_vm2, %v955_v12, %v1494_v33 }
 0x55a   :  { %v1502_v34 = vpop.permute.xlu0 %1501 }
 0x55b   :  { %v1496_v35 = vpop.permute.xlu1 %1495  ;;  %v1518_v37 = vsel %vm1517_vm4, %v1515_v36, %v1502_v34 }
 0x55c   :  { %v1516_v41 = vsel %vm173_vm2, %v1031_v9, %v1496_v35 }
 0x55e   :  { %v1510_v38 = vpop.permute.xlu0 %1509 }
 0x55f   :  { %v1504_v39 = vpop.permute.xlu1 %1503  ;;  %v1521_v40 = vsel %vm1520_vm5, %v1518_v37, %v1510_v38 }
 0x560   :  { %1808 = vmatprep.mubr.msk.f32.mxu0 %vm75_vm0, %v1521_v40  ;;  %v1519_v42 = vsel %vm1517_vm4, %v1516_v41, %v1504_v39 }
 0x563   :  { %v1512_v43 = vpop.permute.xlu1 %1511 }
 0x564   :  { %v1522_v44 = vsel %vm1520_vm5, %v1519_v42, %v1512_v43 }
 0x565   :  { %1809 = vmatmul.mubr.msk.f32.vlgmr.msra.gmra.mrb[14].mxu0 %vm75_vm0, %v1522_v44 }
 0x638   :  { %v1810_v46 = vpop.f32.mrb[14].mxu0 }
 0x639   :  { %v1612_v47 = vadd.f32 %v1810_v46, %v1662_v45  ;;  %v1606_v48 = vpop.f32.mrb[15].mxu0 }
 0x63a   :  { %v1607_v49 = vadd.f32 %v1662_v45, %v1606_v48 }
 0x63b   :  { %1616 = vst.msk [vmem:[#allocation8 + $0x8] sm:$0xff] %vm75_vm0, %v1612_v47 }
 0x63c   :  { %1615 = vst.msk [vmem:[#allocation8] sm:$0xff] %vm75_vm0, %v1607_v49 }
 0x63d   :  { %1951 = shalt.err (!%p1948_p0)
}
 0x63e   :  { %s1952_s18 = scalar_lea.hbm %s2275_s5, 256 }
 0x63f   :  { %p1953_p1 = scmp.ne.s32.totalorder %s2275_s5, %s1952_s18  ;;  %p1956_p2 = scmp.lt.u32.totalorder %s1952_s18, %s2275_s5 }
 0x641   :  { %p1958_p3 = pnand %p1956_p2, %p1953_p1 }
 0x643   :  { %1961 = shalt.err (!%p1958_p3)
}
 0x644   :  { %1628 = dma.vmem_to_hbm [thread:$0]  %s1623_s16, 256, %s2275_s5, [#allocation4], %s1970_s30, %s1970_s30, %s1971_s6  }
 0x645   :  { %1966 = dma.done.wait [#allocation4], 256  }
 0x646   :  { %1967 = vsyncadd [#allocation4], 4294967040 }
 0x647   :  { %1632 = vsyncpa [#allocation3], 1 }
 0x648   :  { %1633 = vsyncpa [#allocation6], 1 }
 0x649   :  { %1634 = vsyncpa [#allocation4], 1 }

</bundles_post_ra>
